<compile_context>
chip_gen: v7x
topology: tpu7x:2x2x1
jax: 0.10.0
libtpu: 0.0.40
codegen_flags: <defaults>
</compile_context>

<pallas_src>
import functools

import jax
import jax.numpy as jnp
from jax.experimental import pallas as pl
from jax.experimental.pallas import tpu as pltpu


def _is_v7x():
    try:
        return "v7" in jax.devices()[0].device_kind.lower()
    except Exception:
        return False


def _round_up(x, m):
    return -(-x // m) * m


def _sublane(dtype):
    # packed-sublane multiple per element width (f32 -> 8, bf16 -> 16, i8 -> 32)
    return {4: 8, 2: 16, 1: 32}.get(jnp.dtype(dtype).itemsize, 8)


def _swisht_c_math(x, half_beta, two_ab):
    """Pure-JAX SwishT_C (math in f32, result in x.dtype). Used for tiny inputs
    and ragged tails so XLA can fuse it."""
    xf = x.astype(jnp.float32)
    y = 0.5 * (xf + jnp.tanh(half_beta * xf) * (xf + two_ab))
    return y.astype(x.dtype)


def _kernel_const(x_ref, o_ref, *, half_beta, two_ab):
    # beta/alpha folded as compile-time constants: no SMEM loads per grid step.
    x = x_ref[...].astype(jnp.float32)
    t = jnp.tanh(half_beta * x)                  # single EUP transcendental
    o_ref[...] = (0.5 * (x + t * (x + two_ab))).astype(o_ref.dtype)


def _kernel_smem(scal_ref, x_ref, o_ref):
    # scal_ref: SMEM (2,) f32 = [half_beta, 2*alpha/beta]  (traced-beta path)
    half_beta = scal_ref[0]
    two_ab = scal_ref[1]
    x = x_ref[...].astype(jnp.float32)
    t = jnp.tanh(half_beta * x)
    o_ref[...] = (0.5 * (x + t * (x + two_ab))).astype(o_ref.dtype)


def _pallas_2d(x2d, half_beta, two_ab, static_scalars):
    rows, width = x2d.shape
    itemsize = jnp.dtype(x2d.dtype).itemsize
    sub = _sublane(x2d.dtype)
    v7x = _is_v7x()

    if rows <= sub:
        row_tile = rows                          # full-extent block, one step
    else:
        # ~4 MiB blocks on v5e/v6e, ~8 MiB on v7x (per-step overhead <~6%).
        target_bytes = (8 if v7x else 4) * 1024 * 1024
        target_rows = max(sub, ((target_bytes // (width * itemsize)) // sub) * sub)
        # at least 2 grid steps so the DMA pipeline (and v7x's 2 TCs) get work
        half_rows = _round_up(-(-rows // 2), sub)
        row_tile = min(target_rows, half_rows)
        if v7x:
            # prefer an even number of grid steps: balanced dual-TC split
            while row_tile > sub and pl.cdiv(rows, row_tile) % 2 == 1:
                row_tile -= sub
    grid = (pl.cdiv(rows, row_tile),)

    data_spec = pl.BlockSpec((row_tile, width), lambda i: (i, 0))
    out_shape = jax.ShapeDtypeStruct((rows, width), x2d.dtype)
    compiler_params = pltpu.CompilerParams(
        dimension_semantics=("parallel",),
        # 2 arrays x 2 buffers x block: 40 MiB stays under v7x's 64 MiB VMEM;
        # 32 MiB raises v5e's 16 MiB default scoped limit, fine on v6e.
        vmem_limit_bytes=(40 if v7x else 32) * 1024 * 1024,
    )

    if static_scalars:
        kernel = functools.partial(
            _kernel_const, half_beta=float(half_beta), two_ab=float(two_ab))
        return pl.pallas_call(
            kernel,
            out_shape=out_shape,
            grid=grid,
            in_specs=[data_spec],
            out_specs=data_spec,
            compiler_params=compiler_params,
        )(x2d)

    scalars = jnp.stack([jnp.asarray(half_beta, jnp.float32),
                         jnp.asarray(two_ab, jnp.float32)])
    return pl.pallas_call(
        _kernel_smem,
        out_shape=out_shape,
        grid=grid,
        in_specs=[pl.BlockSpec(memory_space=pltpu.SMEM), data_spec],
        out_specs=data_spec,
        compiler_params=compiler_params,
    )(scalars, x2d)


def swisht_c(x, beta=1.5, alpha=0.1, *, min_pallas_elements=65536):
    """SwishT_C applied elementwise to x (any shape); math in f32, HBM in x.dtype."""
    orig_shape = x.shape
    n = x.size

    static_scalars = isinstance(beta, (int, float)) and isinstance(alpha, (int, float))
    if static_scalars:
        half_beta = 0.5 * float(beta)
        two_ab = 2.0 * float(alpha) / float(beta)
    else:
        # beta may be a traced / checkpointed scalar: derive constants with jnp.
        beta_f = jnp.asarray(beta, jnp.float32).reshape(())
        alpha_f = jnp.asarray(alpha, jnp.float32).reshape(())
        half_beta = 0.5 * beta_f
        two_ab = 2.0 * alpha_f / beta_f

    # Tiny inputs: pure-JAX expression so XLA fuses it with the producer
    # instead of paying the custom-call boundary + pipeline overhead.
    if n == 0 or n < min_pallas_elements:
        return _swisht_c_math(x, half_beta, two_ab)

    xf = x.reshape(-1)

    # Lane-dense width that divides n exactly (common conv shapes): no copies.
    width = None
    for w in (4096, 2048, 1024, 512, 256, 128):
        if n % w == 0:
            width = w
            break

    if width is not None:
        out2d = _pallas_2d(xf.reshape(n // width, width),
                           half_beta, two_ab, static_scalars)
        return out2d.reshape(orig_shape)

    # Ragged n: Pallas on the largest width-divisible prefix, plain (fused) XLA
    # on the (<width)-element tail.  Replaces the old O(n) pad + O(n) slice.
    width = 512
    n_main = (n // width) * width
    if n_main == 0:
        return _swisht_c_math(x, half_beta, two_ab)
    head = _pallas_2d(xf[:n_main].reshape(n_main // width, width),
                      half_beta, two_ab, static_scalars).reshape(-1)
    tail = _swisht_c_math(xf[n_main:], half_beta, two_ab)
    return jnp.concatenate([head, tail]).reshape(orig_shape)


def _reference(x, beta=1.5, alpha=0.1):
    xf = x.astype(jnp.float32)
    y = jax.nn.sigmoid(beta * xf) * (xf + 2 * alpha / beta) - alpha / beta
    return y.astype(x.dtype)


if __name__ == "__main__":
    key = jax.random.PRNGKey(0)
    beta_init, alpha = 1.5, 0.1
    k1, k2, k3, k4 = jax.random.split(key, 4)

    # 1) Multi-block grid path (f32, width=4096, rows=16 -> 2 grid steps).
    x1 = jax.random.normal(k1, (2, 8, 64, 64), dtype=jnp.float32)
    y1 = jax.block_until_ready(swisht_c(x1, beta_init, alpha))
    assert y1.shape == x1.shape and y1.dtype == x1.dtype
    assert jnp.max(jnp.abs(y1 - _reference(x1, beta_init, alpha))) < 1e-5

    # 2) Module-typical tiny NCHW shape, Pallas path forced.
    x2 = jax.random.normal(k2, (2, 4, 16, 16), dtype=jnp.float32)
    y2 = jax.block_until_ready(swisht_c(x2, beta_init, alpha, min_pallas_elements=0))
    assert y2.shape == x2.shape and y2.dtype == x2.dtype
    assert jnp.max(jnp.abs(y2 - _reference(x2, beta_init, alpha))) < 1e-5
    # same shape through the default small-input (XLA-fused) fallback
    y2b = jax.block_until_ready(swisht_c(x2, beta_init, alpha))
    assert jnp.max(jnp.abs(y2b - _reference(x2, beta_init, alpha))) < 1e-5

    # 3) Ragged element count -> Pallas prefix + XLA tail.
    x3 = jax.random.normal(k3, (3, 5, 7, 11), dtype=jnp.float32)
    y3 = jax.block_until_ready(swisht_c(x3, beta_init, alpha, min_pallas_elements=0))
    assert y3.shape == x3.shape and y3.dtype == x3.dtype
    assert jnp.max(jnp.abs(y3 - _reference(x3, beta_init, alpha))) < 1e-5

    # 4) bf16 activations (packed sublane-16 tiling path).
    x4 = jax.random.normal(k4, (2, 8, 32, 32), dtype=jnp.bfloat16)
    y4 = jax.block_until_ready(swisht_c(x4, beta_init, alpha, min_pallas_elements=0))
    assert y4.shape == x4.shape and y4.dtype == x4.dtype
    err4 = jnp.max(jnp.abs(y4.astype(jnp.float32)
                           - _reference(x4, beta_init, alpha).astype(jnp.float32)))
    assert err4 < 5e-2

    # 5) Traced (non-static) beta -> SMEM scalar path.
    y5 = jax.block_until_ready(
        swisht_c(x2, jnp.asarray(beta_init, jnp.float32), alpha,
                 min_pallas_elements=0))
    assert jnp.max(jnp.abs(y5 - _reference(x2, beta_init, alpha))) < 1e-5

    print("KERNEL_OK")
</pallas_src>

<mosaic_0001>
module attributes {stable_mosaic.version = 11 : i64} {
  func.func @_kernel_const(%arg0: i32, %arg1: memref<8x4096xf32, #tpu.memory_space<vmem>>, %arg2: memref<8x4096xf32, #tpu.memory_space<vmem>>) attributes {dimension_semantics = [#tpu.dimension_semantics<parallel>], iteration_bounds = array<i64: 2>, scalar_prefetch = 0 : i64, scratch_operands = 0 : i64, tpu.core_type = #tpu.core_type<tc>, window_params = [{transform_indices = @transform_0, window_bounds = array<i64: 8, 4096>}, {transform_indices = @transform_1, window_bounds = array<i64: 8, 4096>}]} {
    %c0 = arith.constant 0 : index
    %c0_0 = arith.constant 0 : index
    %0 = vector.load %arg1[%c0, %c0_0] : memref<8x4096xf32, #tpu.memory_space<vmem>>, vector<8x4096xf32>
    %cst = arith.constant 7.500000e-01 : f32
    %1 = vector.broadcast %cst : f32 to vector<8x4096xf32>
    %2 = arith.mulf %1, %0 : vector<8x4096xf32>
    %3 = math.tanh %2 : vector<8x4096xf32>
    %cst_1 = arith.constant 0.13333334 : f32
    %4 = vector.broadcast %cst_1 : f32 to vector<8x4096xf32>
    %5 = arith.addf %0, %4 : vector<8x4096xf32>
    %6 = arith.mulf %3, %5 : vector<8x4096xf32>
    %7 = arith.addf %0, %6 : vector<8x4096xf32>
    %cst_2 = arith.constant 5.000000e-01 : f32
    %8 = vector.broadcast %cst_2 : f32 to vector<8x4096xf32>
    %9 = arith.mulf %8, %7 : vector<8x4096xf32>
    %c0_3 = arith.constant 0 : index
    %c0_4 = arith.constant 0 : index
    %10 = vector.load %arg2[%c0_3, %c0_4] : memref<8x4096xf32, #tpu.memory_space<vmem>>, vector<8x4096xf32>
    tpu.vector_store %arg2[%c0_3, %c0_4], %9 {strides = array<i32>} : memref<8x4096xf32, #tpu.memory_space<vmem>>, vector<8x4096xf32>,
    return
  }
  func.func @transform_0(%arg0: i32) -> (i32, i32) {
    %c0_i32 = arith.constant 0 : i32
    %c0_i32_0 = arith.constant 0 : i32
    return %arg0, %c0_i32 : i32, i32
  }
  func.func @transform_1(%arg0: i32) -> (i32, i32) {
    %c0_i32 = arith.constant 0 : i32
    %c0_i32_0 = arith.constant 0 : i32
    return %arg0, %c0_i32 : i32, i32
  }
}

</mosaic_0001>

<bundles_post_ra>
// kernel: tpu_custom_call.1
= control target key start
LH: loop header
LB: loop body
LE: loop exit
PB: predicated region body
PF: predicated region fallthrough
CT: control target
= control target key end

     0   :  { %6 = vsyncpa [#allocation3], 0  ;;  %s1154_s0 = inlined_call_operand.hbm [shape: f32[16,4096], index: 0, kind: input, shape index: {}]   ;;  %s1155_s1 = inlined_call_operand.hbm [shape: f32[16,4096], index: 1, kind: output, shape index: {}]  }
   0x1   :  { %8 = vsyncpa [#allocation3 + $0x1], 0 }
   0x2   :  { %9 = vsyncpa [#allocation4], 0 }
   0x3   :  { %11 = vsyncpa [#allocation4 + $0x1], 0  ;;  %s710_s6 = smov 0   ;;  %s712_s7 = smov 0  }
   0x4   :  { %s714_s8 = smov 0   ;;  %s716_s9 = smov 0  }
   0x5 LB: > { %s731_s10 = sadd.s32 4294967295, %s696_s9   ;;  %s474_s11 = sadd.s32 4294967294, %s696_s9   ;;  %s696_s9 = sphi %s716_s9, %s1170_s9   ;;  %s692_s8 = sphi %s714_s8, %s1169_s8   ;;  %s688_s7 = sphi %s712_s7, %s1168_s7   ;;  %s684_s6 = sphi %s710_s6, %s1167_s6  }
   0x6   : > { %s735_s12 = sadd.s32 1, %s696_s9   ;;  %s24_s13 = sadd.s32 1, %s692_s8 }
   0x7   : > { %s21_s14 = ssub.s32 %s696_s9, %s735_s12  ;;  %p31_p0 = scmp.ne.s32.totalorder %s692_s8, %s688_s7 }
   0x8   : > { %p22_p1 = scmp.eq.s32.totalorder %s21_s14, 0  ;;  %p32_p2 = scmp.eq.s32.totalorder %s696_s9, 0 }
   0x9   : > { %p37_p3 = scmp.ne.s32.totalorder %s688_s7, %s684_s6  ;;  %p38_p4 = scmp.eq.s32.totalorder %s731_s10, 0 }
   0xa   : > { %s747_s15 = scalar_select %p22_p1, %s692_s8, %s24_s13  }
   0xb   : > { %p749_p5 = por %p32_p2, %p31_p0  ;;  %p753_p6 = por %p38_p4, %p37_p3 }
   0xc   : > { %p61_p7 = scmp.eq.s32.totalorder %s731_s10, 1  ;;  %p67_p8 = scmp.eq.s32.totalorder %s474_s11, 1 }
   0xd   : > { %p502_p10 = scmp.lt.s32.totalorder %s696_s9, 2  ;;  %s87_s20 = sand.u32 1, %s692_s8  }
   0xe   : > { %p760_p11 = por %p61_p7, %p31_p0  ;;  %p764_p12 = por %p67_p8, %p37_p3 }
   0xf   : > { %s488_s21 = sshll.u32 %s696_s9, 12  ;;  %s477_s22 = sshll.u32 %s87_s20, 8 }
  0x10   : > { %s1159_s18 = scalar_select %p760_p11, 1, 0 }
  0x11   : > { %s1160_s19 = scalar_select %p764_p12, 1, 0 }
  0x12   : > { %s773_s25 = scalar_lea.hbm %s1154_s0, %s488_s21  ;;  %s91_s26 = scalar_lea.vmem [#allocation2], %s477_s22 }
  0x13   : > { %s99_s27 = sshll.u32 %s91_s26, 4  ;;  %p777_p13 = pnand %p502_p10, %p749_p5  ;;  %s781_s27 = int_to_ptr.vmem [resolvable:$true] %s99_s27 }
  0x14   : > { %s88_s29 = scalar_lea.sflag [#allocation3], %s87_s20  ;;  %s600_s30 = scalar_lea.hbm %s773_s25, 4096 }
  0x15   : > { %p601_p2 = scmp.ne.s32.totalorder %s773_s25, %s600_s30  ;;  %p602_p3 = pneg %p777_p13 }
  0x16   : > { %s605_s4 = scalar_lea.hbm %s1154_s0, 8192  ;;  %p606_p5 = scmp.lt.u32.totalorder %s773_s25, %s1154_s0 }
  0x17   : > { %p603_p4 = pnand %p602_p3, %p601_p2  ;;  %p607_p8 = scmp.lt.u32.totalorder %s605_s4, %s600_s30 }
  0x18   : > { %p609_p9 = scmp.lt.u32.totalorder %s600_s30, %s773_s25 }
  0x19   : > { %p604_p7 = pneg %p603_p4  ;;  %p608_p10 = por %p607_p8, %p606_p5 }
  0x1b   : > { %p610_p0 = por %p609_p9, %p608_p10 }
  0x1d   : > { %p611_p1 = pnand %p610_p0, %p604_p7 }
  0x1f   : > { %614 = shalt.err (!%p611_p1)
}
  0x20   : > { %s615_s13 = scalar_lea.vmem %s781_s27, 4096  ;;  %s698_s14 = smov [#allocation2]  }
  0x21   : > { %p616_p2 = scmp.ne.s32.totalorder %s781_s27, %s615_s13  ;;  %s620_s16 = sshll.u32 %s698_s14, 4  ;;  %s621_s16 = int_to_ptr.vmem [resolvable:$false] %s620_s16 }
  0x22   : > { %s622_s20 = scalar_lea.vmem %s621_s16, 8192  ;;  %p623_p11 = scmp.lt.s32.totalorder %s781_s27, %s621_s16 }
  0x23   : > { %p618_p4 = pnand %p616_p2, %p602_p3  ;;  %p624_p5 = scmp.lt.s32.totalorder %s622_s20, %s615_s13 }
  0x25   : > { %p619_p12 = pneg %p618_p4  ;;  %p625_p8 = por %p624_p5, %p623_p11 }
  0x27   : > { %p626_p9 = pnand %p625_p8, %p619_p12 }
  0x29   : > { %629 = shalt.err (!%p626_p9)
}
  0x2a   : > { %497 = dma.hbm_to_vmem [thread:$0]  (!%p777_p13), %s773_s25, 4096, %s781_s27, %s88_s29  }
  0x2b   : > { %p1162_p0 = scmp.lt.s32.totalorder %s696_s9, 3  ;;  %p1163_p1 = scmp.ge.s32.totalorder %s696_s9, 1 }
  0x2d   : > { %p105_p3 = pnand %p1163_p1, %p1162_p0 }
  0x2e   : > { %s815_s21 = sand.u32 (!%p105_p3), 1, %s688_s7  }
  0x2f   : > { %108 = sbr.rel (%p105_p3) target bundleno = 129 (0x81), region = 24  ;;  %s481_s22 = sshll.u32 (!%p105_p3), %s815_s21, 8 }
  0x30   : > { %s111_s23 = scalar_lea.sflag (!%p105_p3), [#allocation3], %s815_s21  ;;  %s821_s24 = scalar_lea.vmem (!%p105_p3), [#allocation2], %s481_s22 }
  0x36   : > { %675 = dma.done.wait (%p753_p6), %s111_s23, 4096  }
  0x37   : > { %677 = vsyncadd (%p753_p6), %s111_s23, 4294963200  ;;  %v828_v0 = vld [vmem:[%s821_s24] sm:$0xff]  ;;  %v831_v1 = vld [vmem:[%s821_s24 + $0x8] sm:$0xff]  ;;  %s991_s17 = scalar_lea.vmem [#allocation5], %s481_s22  ;;  %s489_s25 = sshll.u32 %s731_s10, 12 }
  0x38   : > { %v834_v2 = vld [vmem:[%s821_s24 + $0x10] sm:$0xff]  ;;  %v165_v3 = vmul.f32 0.75, %v828_v0  ;;  %v838_v4 = vadd.f32 0.13333334, %v828_v0  ;;  %v166_v5 = vmul.f32 0.75, %v831_v1  ;;  %v846_v8 = vld [vmem:[%s821_s24 + $0x18] sm:$0xff]  ;;  %s1108_s29 = scalar_lea.hbm %s1155_s1, %s489_s25 }
  0x39   : > { %v842_v6 = vadd.f32 0.13333334, %v831_v1  ;;  %v167_v7 = vmul.f32 0.75, %v834_v2  ;;  %v849_v9 = vld [vmem:[%s821_s24 + $0x20] sm:$0xff]  ;;  %v852_v10 = vld [vmem:[%s821_s24 + $0x28] sm:$0xff]  ;;  %v168_v12 = vmul.f32 0.75, %v846_v8 }
  0x3a   : > { %536 = vtanh.f32 %v165_v3  ;;  %v855_v11 = vadd.f32 0.13333334, %v834_v2  ;;  %v169_v13 = vmul.f32 0.75, %v849_v9  ;;  %v860_v14 = vld [vmem:[%s821_s24 + $0x30] sm:$0xff]  ;;  %v863_v15 = vld [vmem:[%s821_s24 + $0x38] sm:$0xff]  ;;  %v170_v18 = vmul.f32 0.75, %v852_v10 }
  0x3b   : > { %538 = vtanh.f32 %v166_v5  ;;  %v866_v16 = vadd.f32 0.13333334, %v846_v8  ;;  %v869_v17 = vadd.f32 0.13333334, %v849_v9  ;;  %v873_v19 = vld [vmem:[%s821_s24 + $0x40] sm:$0xff]  ;;  %v171_v21 = vmul.f32 0.75, %v860_v14 }
  0x3c   : > { %540 = vtanh.f32 %v167_v7  ;;  %v876_v20 = vadd.f32 0.13333334, %v852_v10  ;;  %v880_v22 = vld [vmem:[%s821_s24 + $0x48] sm:$0xff]  ;;  %v883_v23 = vld [vmem:[%s821_s24 + $0x50] sm:$0xff]  ;;  %v886_v24 = vadd.f32 0.13333334, %v860_v14 }
  0x3d   : > { %542 = vtanh.f32 %v168_v12  ;;  %v172_v25 = vmul.f32 0.75, %v863_v15  ;;  %v890_v26 = vadd.f32 0.13333334, %v863_v15  ;;  %v893_v27 = vld [vmem:[%s821_s24 + $0x58] sm:$0xff]  ;;  %v173_v28 = vmul.f32 0.75, %v873_v19  ;;  %v901_v31 = vld [vmem:[%s821_s24 + $0x60] sm:$0xff] }
  0x3e   : > { %544 = vtanh.f32 %v169_v13  ;;  %v897_v29 = vadd.f32 0.13333334, %v873_v19  ;;  %v174_v30 = vmul.f32 0.75, %v880_v22  ;;  %v904_v32 = vld [vmem:[%s821_s24 + $0x68] sm:$0xff]  ;;  %v907_v33 = vadd.f32 0.13333334, %v880_v22 }
  0x3f   : > { %546 = vtanh.f32 %v170_v18  ;;  %v175_v34 = vmul.f32 0.75, %v883_v23  ;;  %v911_v35 = vadd.f32 0.13333334, %v883_v23  ;;  %v914_v36 = vld [vmem:[%s821_s24 + $0x70] sm:$0xff]  ;;  %v176_v37 = vmul.f32 0.75, %v893_v27  ;;  %v922_v40 = vld [vmem:[%s821_s24 + $0x78] sm:$0xff] }
  0x40   : > { %548 = vtanh.f32 %v171_v21  ;;  %v918_v38 = vadd.f32 0.13333334, %v893_v27  ;;  %v177_v39 = vmul.f32 0.75, %v901_v31  ;;  %v925_v41 = vld [vmem:[%s821_s24 + $0x80] sm:$0xff]  ;;  %v928_v42 = vadd.f32 0.13333334, %v901_v31 }
  0x41   : > { %550 = vtanh.f32 %v172_v25  ;;  %v178_v43 = vmul.f32 0.75, %v904_v32  ;;  %v932_v44 = vadd.f32 0.13333334, %v904_v32  ;;  %v935_v45 = vld [vmem:[%s821_s24 + $0x88] sm:$0xff]  ;;  %v179_v46 = vmul.f32 0.75, %v914_v36  ;;  %v943_v49 = vld [vmem:[%s821_s24 + $0x90] sm:$0xff] }
  0x42   : > { %552 = vtanh.f32 %v173_v28  ;;  %v939_v47 = vadd.f32 0.13333334, %v914_v36  ;;  %v180_v48 = vmul.f32 0.75, %v922_v40  ;;  %v946_v50 = vld [vmem:[%s821_s24 + $0x98] sm:$0xff]  ;;  %v949_v51 = vadd.f32 0.13333334, %v922_v40 }
  0x43   : > { %554 = vtanh.f32 %v174_v30  ;;  %v181_v52 = vmul.f32 0.75, %v925_v41  ;;  %v953_v53 = vadd.f32 0.13333334, %v925_v41  ;;  %v956_v54 = vld [vmem:[%s821_s24 + $0xa0] sm:$0xff]  ;;  %v182_v56 = vmul.f32 0.75, %v935_v45  ;;  %v964_v59 = vld [vmem:[%s821_s24 + $0xa8] sm:$0xff] }
  0x44   : > { %v537_v55 = vpop.eup %536  ;;  %556 = vtanh.f32 %v175_v34  ;;  %v960_v57 = vadd.f32 0.13333334, %v935_v45  ;;  %v183_v58 = vmul.f32 0.75, %v943_v49  ;;  %v968_v62 = vadd.f32 0.13333334, %v943_v49  ;;  %v972_v3 = vld [vmem:[%s821_s24 + $0xb0] sm:$0xff] }
  0x45   : > { %v539_v60 = vpop.eup %538  ;;  %v261_v61 = vmul.f32 %v537_v55, %v838_v4  ;;  %558 = vtanh.f32 %v176_v37  ;;  %v184_v63 = vmul.f32 0.75, %v946_v50  ;;  %v976_v12 = vadd.f32 0.13333334, %v946_v50  ;;  %s404_s26 = sshll.u32 %s991_s17, 4  ;;  %s390_s10 = scalar_lea.sflag [#allocation4], %s815_s21  ;;  %s1110_s26 = int_to_ptr.vmem [resolvable:$true] %s404_s26 }
  0x46   : > { %v541_v5 = vpop.eup %540  ;;  %v262_v7 = vmul.f32 %v539_v60, %v842_v6  ;;  %560 = vtanh.f32 %v177_v39  ;;  %v185_v13 = vmul.f32 0.75, %v956_v54  ;;  %v186_v25 = vmul.f32 0.75, %v964_v59  ;;  %s630_s30 = scalar_lea.vmem %s1110_s26, 4096  ;;  %p1164_p11 = scmp.ne.s32.totalorder %s1159_s18, 0 }
  0x47   : > { %v543_v18 = vpop.eup %542  ;;  %v293_v4 = vadd.f32 %v261_v61, %v828_v0  ;;  %v263_v21 = vmul.f32 %v541_v5, %v855_v11  ;;  %562 = vtanh.f32 %v178_v43  ;;  %v187_v34 = vmul.f32 0.75, %v972_v3  ;;  %p631_p6 = scmp.ne.s32.totalorder %s1110_s26, %s630_s30  ;;  %s699_s2 = smov [#allocation5]  }
  0x48   : > { %v545_v28 = vpop.eup %544  ;;  %v294_v30 = vadd.f32 %v262_v7, %v831_v1  ;;  %v264_v6 = vmul.f32 %v543_v18, %v866_v16  ;;  %564 = vtanh.f32 %v179_v46  ;;  %s634_s3 = sshll.u32 %s699_s2, 4  ;;  %s635_s3 = int_to_ptr.vmem [resolvable:$false] %s634_s3 }
  0x49   : > { %v547_v37 = vpop.eup %546  ;;  %v325_v39 = vmul.f32 0.5, %v293_v4  ;;  %v295_v55 = vadd.f32 %v263_v21, %v834_v2  ;;  %v265_v0 = vmul.f32 %v545_v28, %v869_v17  ;;  %566 = vtanh.f32 %v180_v48  ;;  %p632_p12 = pnand %p631_p6, %p1164_p11  ;;  %s636_s4 = scalar_lea.vmem %s635_s3, 8192 }
  0x4a   : > { %v549_v11 = vpop.eup %548  ;;  %v326_v43 = vmul.f32 0.5, %v294_v30  ;;  %v296_v60 = vadd.f32 %v264_v6, %v846_v8  ;;  %v266_v61 = vmul.f32 %v547_v37, %v876_v20  ;;  %568 = vtanh.f32 %v181_v52  ;;  %p637_p7 = scmp.lt.s32.totalorder %s1110_s26, %s635_s3  ;;  %p638_p10 = scmp.lt.s32.totalorder %s636_s4, %s630_s30 }
  0x4b   : > { %v551_v1 = vpop.eup %550  ;;  %357 = vst [vmem:[%s991_s17] sm:$0xff] %v325_v39  ;;  %v327_v16 = vmul.f32 0.5, %v295_v55  ;;  %v297_v2 = vadd.f32 %v265_v0, %v849_v9  ;;  %v267_v17 = vmul.f32 %v549_v11, %v886_v24  ;;  %570 = vtanh.f32 %v182_v56  ;;  %p633_p13 = pneg %p632_p12 }
  0x4c   : > { %v553_v46 = vpop.eup %552  ;;  %358 = vst [vmem:[%s991_s17 + $0x8] sm:$0xff] %v326_v43  ;;  %v328_v8 = vmul.f32 0.5, %v296_v60  ;;  %v298_v20 = vadd.f32 %v266_v61, %v852_v10  ;;  %v268_v48 = vmul.f32 %v551_v1, %v890_v26  ;;  %572 = vtanh.f32 %v183_v58  ;;  %p639_p2 = por %p638_p10, %p637_p7 }
  0x4d   : > { %v555_v52 = vpop.eup %554  ;;  %359 = vst [vmem:[%s991_s17 + $0x10] sm:$0xff] %v327_v16  ;;  %v329_v5 = vmul.f32 0.5, %v297_v2  ;;  %v299_v7 = vadd.f32 %v267_v17, %v860_v14  ;;  %v269_v9 = vmul.f32 %v553_v46, %v897_v29  ;;  %574 = vtanh.f32 %v184_v63  ;;  %v1009_v29 = vld [vmem:[%s821_s24 + $0xb8] sm:$0xff]  ;;  %v1037_v16 = vld [vmem:[%s821_s24 + $0xc8] sm:$0xff] }
  0x4e   : > { %v557_v24 = vpop.eup %556  ;;  %360 = vst [vmem:[%s991_s17 + $0x18] sm:$0xff] %v328_v8  ;;  %v330_v56 = vmul.f32 0.5, %v298_v20  ;;  %v300_v18 = vadd.f32 %v268_v48, %v863_v15  ;;  %v270_v10 = vmul.f32 %v555_v52, %v907_v33  ;;  %576 = vtanh.f32 %v185_v13  ;;  %p640_p4 = pnand %p639_p2, %p633_p13 }
  0x4f   : > { %v559_v26 = vpop.eup %558  ;;  %361 = vst [vmem:[%s991_s17 + $0x20] sm:$0xff] %v329_v5  ;;  %v331_v58 = vmul.f32 0.5, %v299_v7  ;;  %v301_v4 = vadd.f32 %v269_v9, %v873_v19  ;;  %v271_v14 = vmul.f32 %v557_v24, %v911_v35  ;;  %578 = vtanh.f32 %v186_v25  ;;  %v1051_v7 = vld [vmem:[%s821_s24 + $0xd0] sm:$0xff] }
  0x50   : > { %v561_v63 = vpop.eup %560  ;;  %362 = vst [vmem:[%s991_s17 + $0x28] sm:$0xff] %v330_v56  ;;  %v332_v21 = vmul.f32 0.5, %v300_v18  ;;  %v302_v15 = vadd.f32 %v270_v10, %v880_v22  ;;  %v272_v33 = vmul.f32 %v559_v26, %v918_v38  ;;  %580 = vtanh.f32 %v187_v34  ;;  %v1023_v34 = vld [vmem:[%s821_s24 + $0xc0] sm:$0xff]  ;;  %v1057_v18 = vld [vmem:[%s821_s24 + $0xd8] sm:$0xff] }
  0x51   : > { %v563_v13 = vpop.eup %562  ;;  %363 = vst [vmem:[%s991_s17 + $0x30] sm:$0xff] %v331_v58  ;;  %v333_v28 = vmul.f32 0.5, %v301_v4  ;;  %v303_v19 = vadd.f32 %v271_v14, %v883_v23  ;;  %v273_v35 = vmul.f32 %v561_v63, %v928_v42  ;;  %v249_v25 = vadd.f32 0.13333334, %v956_v54  ;;  %v1065_v63 = vld [vmem:[%s821_s24 + $0xe0] sm:$0xff] }
  0x52   : > { %v565_v30 = vpop.eup %564  ;;  %364 = vst [vmem:[%s991_s17 + $0x38] sm:$0xff] %v332_v21  ;;  %v334_v6 = vmul.f32 0.5, %v302_v15  ;;  %v304_v37 = vadd.f32 %v272_v33, %v893_v27  ;;  %v274_v22 = vmul.f32 %v563_v13, %v932_v44  ;;  %v188_v38 = vmul.f32 0.75, %v1009_v29  ;;  %v162_v33 = vld [vmem:[%s821_s24 + $0xe8] sm:$0xff] }
  0x53   : > { %v567_v39 = vpop.eup %566  ;;  %365 = vst [vmem:[%s991_s17 + $0x40] sm:$0xff] %v333_v28  ;;  %v335_v23 = vmul.f32 0.5, %v303_v19  ;;  %v305_v42 = vadd.f32 %v273_v35, %v901_v31  ;;  %v275_v55 = vmul.f32 %v565_v30, %v939_v47  ;;  %v250_v0 = vadd.f32 0.13333334, %v964_v59  ;;  %v1075_v19 = vld [vmem:[%s821_s24 + $0xf8] sm:$0xff] }
  0x54   : > { %v569_v11 = vpop.eup %568  ;;  %366 = vst [vmem:[%s991_s17 + $0x48] sm:$0xff] %v334_v6  ;;  %v336_v27 = vmul.f32 0.5, %v304_v37  ;;  %v306_v44 = vadd.f32 %v274_v22, %v904_v32  ;;  %v276_v43 = vmul.f32 %v567_v39, %v949_v51  ;;  %582 = vtanh.f32 %v188_v38 }
  0x55   : > { %v571_v60 = vpop.eup %570  ;;  %367 = vst [vmem:[%s991_s17 + $0x50] sm:$0xff] %v335_v23  ;;  %v337_v61 = vmul.f32 0.5, %v305_v42  ;;  %v307_v1 = vadd.f32 %v275_v55, %v914_v36  ;;  %v277_v31 = vmul.f32 %v569_v11, %v953_v53  ;;  %v189_v47 = vmul.f32 0.75, %v1023_v34 }
  0x56   : > { %v573_v2 = vpop.eup %572  ;;  %368 = vst [vmem:[%s991_s17 + $0x58] sm:$0xff] %v336_v27  ;;  %v338_v17 = vmul.f32 0.5, %v306_v44  ;;  %v308_v32 = vadd.f32 %v276_v43, %v922_v40  ;;  %v278_v51 = vmul.f32 %v571_v60, %v960_v57  ;;  %v251_v46 = vadd.f32 0.13333334, %v972_v3 }
  0x57   : > { %v575_v8 = vpop.eup %574  ;;  %369 = vst [vmem:[%s991_s17 + $0x60] sm:$0xff] %v337_v61  ;;  %v339_v36 = vmul.f32 0.5, %v307_v1  ;;  %v309_v53 = vadd.f32 %v277_v31, %v925_v41  ;;  %v279_v20 = vmul.f32 %v573_v2, %v968_v62  ;;  %584 = vtanh.f32 %v189_v47 }
  0x58   : > { %v577_v48 = vpop.eup %576  ;;  %370 = vst [vmem:[%s991_s17 + $0x68] sm:$0xff] %v338_v17  ;;  %v340_v52 = vmul.f32 0.5, %v308_v32  ;;  %v310_v40 = vadd.f32 %v278_v51, %v935_v45  ;;  %v280_v57 = vmul.f32 %v575_v8, %v976_v12  ;;  %v190_v5 = vmul.f32 0.75, %v1037_v16 }
  0x59   : > { %v579_v9 = vpop.eup %578  ;;  %371 = vst [vmem:[%s991_s17 + $0x70] sm:$0xff] %v339_v36  ;;  %v341_v41 = vmul.f32 0.5, %v309_v53  ;;  %v311_v62 = vadd.f32 %v279_v20, %v943_v49  ;;  %v281_v24 = vmul.f32 %v577_v48, %v249_v25  ;;  %v252_v56 = vadd.f32 0.13333334, %v1009_v29 }
  0x5a   : > { %v581_v45 = vpop.eup %580  ;;  %372 = vst [vmem:[%s991_s17 + $0x78] sm:$0xff] %v340_v52  ;;  %v342_v12 = vmul.f32 0.5, %v310_v40  ;;  %v312_v10 = vadd.f32 %v280_v57, %v946_v50  ;;  %v282_v26 = vmul.f32 %v579_v9, %v250_v0  ;;  %586 = vtanh.f32 %v190_v5 }
  0x5b   : > { %373 = vst [vmem:[%s991_s17 + $0x80] sm:$0xff] %v341_v41  ;;  %v343_v58 = vmul.f32 0.5, %v311_v62  ;;  %v313_v49 = vadd.f32 %v281_v24, %v956_v54  ;;  %v283_v4 = vmul.f32 %v581_v45, %v251_v46  ;;  %v191_v14 = vmul.f32 0.75, %v1051_v7  ;;  %v163_v54 = vld [vmem:[%s821_s24 + $0xf0] sm:$0xff] }
  0x5c   : > { %374 = vst [vmem:[%s991_s17 + $0x88] sm:$0xff] %v342_v12  ;;  %v344_v21 = vmul.f32 0.5, %v312_v10  ;;  %v314_v15 = vadd.f32 %v282_v26, %v964_v59  ;;  %v192_v50 = vmul.f32 0.75, %v1057_v18  ;;  %v253_v30 = vadd.f32 0.13333334, %v1023_v34 }
  0x5d   : > { %375 = vst [vmem:[%s991_s17 + $0x90] sm:$0xff] %v343_v58  ;;  %v345_v13 = vmul.f32 0.5, %v313_v49  ;;  %v315_v28 = vadd.f32 %v283_v4, %v972_v3  ;;  %588 = vtanh.f32 %v191_v14  ;;  %v193_v59 = vmul.f32 0.75, %v1065_v63 }
  0x5e   : > { %v583_v35 = vpop.eup %582  ;;  %376 = vst [vmem:[%s991_s17 + $0x98] sm:$0xff] %v344_v21  ;;  %v346_v25 = vmul.f32 0.5, %v314_v15  ;;  %590 = vtanh.f32 %v192_v50  ;;  %v194_v22 = vmul.f32 0.75, %v162_v33  ;;  %v195_v3 = vmul.f32 0.75, %v163_v54 }
  0x5f   : > { %377 = vst [vmem:[%s991_s17 + $0xa0] sm:$0xff] %v345_v13  ;;  %v347_v6 = vmul.f32 0.5, %v315_v28  ;;  %v284_v37 = vmul.f32 %v583_v35, %v252_v56  ;;  %592 = vtanh.f32 %v193_v59  ;;  %v196_v38 = vmul.f32 0.75, %v1075_v19 }
  0x60   : > { %378 = vst [vmem:[%s991_s17 + $0xa8] sm:$0xff] %v346_v25  ;;  %v254_v42 = vadd.f32 0.13333334, %v1037_v16  ;;  %594 = vtanh.f32 %v194_v22  ;;  %v255_v44 = vadd.f32 0.13333334, %v1051_v7 }
  0x61   : > { %v585_v39 = vpop.eup %584  ;;  %379 = vst [vmem:[%s991_s17 + $0xb0] sm:$0xff] %v347_v6  ;;  %v316_v23 = vadd.f32 %v284_v37, %v1009_v29  ;;  %596 = vtanh.f32 %v195_v3  ;;  %v256_v60 = vadd.f32 0.13333334, %v1057_v18  ;;  %v257_v31 = vadd.f32 0.13333334, %v1065_v63 }
  0x62   : > { %v285_v55 = vmul.f32 %v585_v39, %v253_v30  ;;  %598 = vtanh.f32 %v196_v38  ;;  %v258_v17 = vadd.f32 0.13333334, %v162_v33  ;;  %v260_v36 = vadd.f32 0.13333334, %v1075_v19 }
  0x63   : > { %v348_v0 = vmul.f32 0.5, %v316_v23 }
  0x64   : > { %v587_v11 = vpop.eup %586  ;;  %v317_v27 = vadd.f32 %v285_v55, %v1023_v34  ;;  %v259_v34 = vadd.f32 0.13333334, %v163_v54 }
  0x65   : > { %380 = vst [vmem:[%s991_s17 + $0xb8] sm:$0xff] %v348_v0  ;;  %v286_v43 = vmul.f32 %v587_v11, %v254_v42 }
  0x66   : > { %v349_v61 = vmul.f32 0.5, %v317_v27 }
  0x67   : > { %v589_v29 = vpop.eup %588  ;;  %v318_v1 = vadd.f32 %v286_v43, %v1037_v16 }
  0x68   : > { %v591_v47 = vpop.eup %590  ;;  %381 = vst [vmem:[%s991_s17 + $0xc0] sm:$0xff] %v349_v61  ;;  %v287_v2 = vmul.f32 %v589_v29, %v255_v44 }
  0x69   : > { %v350_v32 = vmul.f32 0.5, %v318_v1  ;;  %v288_v51 = vmul.f32 %v591_v47, %v256_v60  ;;  %v593_v46 = vpop.eup %592 }
  0x6a   : > { %v319_v8 = vadd.f32 %v287_v2, %v1051_v7  ;;  %v595_v53 = vpop.eup %594  ;;  %v289_v20 = vmul.f32 %v593_v46, %v257_v31 }
  0x6b   : > { %382 = vst [vmem:[%s991_s17 + $0xc8] sm:$0xff] %v350_v32  ;;  %v320_v16 = vadd.f32 %v288_v51, %v1057_v18  ;;  %v597_v48 = vpop.eup %596  ;;  %v290_v40 = vmul.f32 %v595_v53, %v258_v17 }
  0x6c   : > { %v351_v52 = vmul.f32 0.5, %v319_v8  ;;  %v599_v57 = vpop.eup %598  ;;  %v321_v9 = vadd.f32 %v289_v20, %v1065_v63  ;;  %v291_v7 = vmul.f32 %v597_v48, %v259_v34 }
  0x6d   : > { %v352_v5 = vmul.f32 0.5, %v320_v16  ;;  %v322_v41 = vadd.f32 %v290_v40, %v162_v33  ;;  %v292_v62 = vmul.f32 %v599_v57, %v260_v36 }
  0x6e   : > { %383 = vst [vmem:[%s991_s17 + $0xd0] sm:$0xff] %v351_v52  ;;  %v353_v24 = vmul.f32 0.5, %v321_v9  ;;  %v323_v56 = vadd.f32 %v291_v7, %v163_v54 }
  0x6f   : > { %384 = vst [vmem:[%s991_s17 + $0xd8] sm:$0xff] %v352_v5  ;;  %v354_v18 = vmul.f32 0.5, %v322_v41  ;;  %v324_v45 = vadd.f32 %v292_v62, %v1075_v19 }
  0x70   : > { %385 = vst [vmem:[%s991_s17 + $0xe0] sm:$0xff] %v353_v24  ;;  %v355_v12 = vmul.f32 0.5, %v323_v56 }
  0x71   : > { %386 = vst [vmem:[%s991_s17 + $0xe8] sm:$0xff] %v354_v18  ;;  %v356_v10 = vmul.f32 0.5, %v324_v45 }
  0x72   : > { %387 = vst [vmem:[%s991_s17 + $0xf0] sm:$0xff] %v355_v12 }
  0x73   : > { %388 = vst [vmem:[%s991_s17 + $0xf8] sm:$0xff] %v356_v10 }
  0x74   : > { %643 = shalt.err (!%p640_p4)
}
  0x75   : > { %s644_s5 = scalar_lea.hbm %s1108_s29, 4096  ;;  %s648_s14 = scalar_lea.hbm %s1155_s1, 8192 }
  0x76   : > { %p645_p5 = scmp.ne.s32.totalorder %s1108_s29, %s644_s5  ;;  %p649_p0 = scmp.lt.u32.totalorder %s1108_s29, %s1155_s1 }
  0x77   : > { %p650_p1 = scmp.lt.u32.totalorder %s648_s14, %s644_s5  ;;  %p652_p6 = scmp.lt.u32.totalorder %s644_s5, %s1108_s29 }
  0x78   : > { %p646_p8 = pnand %p645_p5, %p1164_p11 }
  0x79   : > { %p651_p3 = por %p650_p1, %p649_p0 }
  0x7a   : > { %p647_p9 = pneg %p646_p8 }
  0x7b   : > { %p653_p12 = por %p652_p6, %p651_p3 }
  0x7d   : > { %p654_p13 = pnand %p653_p12, %p647_p9 }
  0x7f   : > { %657 = shalt.err (!%p654_p13)
}
  0x80   : > { %492 = dma.vmem_to_hbm [thread:$0]  (%p1164_p11), %s1110_s26, 4096, %s1108_s29, %s390_s10  }
  0x81 PF: > { %s416_s21 = sand.u32 1, %s684_s6   ;;  %p1165_p7 = scmp.ne.s32.totalorder %s1160_s19, 0 }
  0x82   : > { %p1166_p10 = scmp.ge.s32.totalorder %s696_s9, 2  ;;  %s417_s22 = scalar_lea.sflag [#allocation4], %s416_s21 }
  0x84   : > { %p499_p2 = pnand %p1166_p10, %p1165_p7 }
  0x86   : > { %679 = dma.done.wait (!%p499_p2), %s417_s22, 4096  }
  0x87   : > { %681 = vsyncadd (!%p499_p2), %s417_s22, 4294963200  ;;  %p14_p4 = scmp.ge.s32.totalorder %s735_s12, 4   ;;  %s1167_s6 = smov %s688_s7 }
  0x88   : > { %s1168_s7 = smov %s692_s8  ;;  %s1169_s8 = smov %s747_s15 }
  0x89   : > { %s1170_s9 = smov %s735_s12  ;;  %16 = sbr.rel (!%p14_p4) target bundleno = 5 (0x5), region = 69 }
  0x90   :  { %422 = vsyncpa [#allocation3], 1 }
  0x91   :  { %424 = vsyncpa [#allocation3 + $0x1], 1 }
  0x92   :  { %425 = vsyncpa [#allocation4], 1 }
  0x93   :  { %427 = vsyncpa [#allocation4 + $0x1], 1 }

</bundles_post_ra>
